<compile_context>
chip_gen: v5e
topology: v5e:2x2
jax: 0.10.0
libtpu: 0.0.40
codegen_flags: <defaults>
</compile_context>

<pallas_src>
import functools

import jax
import jax.numpy as jnp
from jax.experimental import pallas as pl
from jax.experimental.pallas import tpu as pltpu

IN_FEATURES = 784
IN_PAD = 896          # 7 * 128 lanes, zero-padded K for fc1
H1, H2, H3 = 128, 64, 32
N_CLASSES = 16        # fc4 output width (forward never uses n_output=10)
OUT_PAD = 128         # lane-dense output slab; real logits live in lanes [0, 16)


def mlp_kernel(x_ref,
               w1_ref, b1_ref,
               w2_ref, b2_ref,
               w3_ref, b3_ref,
               w4_ref, b4_ref,
               o_ref, *, n_classes):
    x = x_ref[...]                                                  # (TB, IN_PAD) bf16

    # fc1 + relu
    h = jnp.dot(x, w1_ref[...], preferred_element_type=jnp.float32) + b1_ref[...]
    h = jnp.maximum(h, 0.0).astype(jnp.bfloat16)

    # fc2 + relu
    h = jnp.dot(h, w2_ref[...], preferred_element_type=jnp.float32) + b2_ref[...]
    h = jnp.maximum(h, 0.0).astype(jnp.bfloat16)

    # dropout(p=0.5): identity at inference.
    # TODO(synk): training-mode dropout (pltpu.prng_* mask + 1/(1-p) scale) not emitted.
    # flatten(x, 1): already (TB, H2) -> no-op.

    # fc3 + relu
    h = jnp.dot(h, w3_ref[...], preferred_element_type=jnp.float32) + b3_ref[...]
    h = jnp.maximum(h, 0.0).astype(jnp.bfloat16)

    # fc4 (output columns >= n_classes are zero-weight/zero-bias padding)
    logits = jnp.dot(h, w4_ref[...], preferred_element_type=jnp.float32) + b4_ref[...]

    # log_softmax over the first n_classes lanes only (padded lanes masked out).
    lane = jax.lax.broadcasted_iota(jnp.int32, logits.shape, dimension=1)
    valid = lane < n_classes
    m = jnp.max(jnp.where(valid, logits, -jnp.inf), axis=1, keepdims=True)
    shifted = logits - m
    lse = jnp.log(jnp.sum(jnp.where(valid, jnp.exp(shifted), 0.0),
                          axis=1, keepdims=True))
    o_ref[...] = (shifted - lse).astype(o_ref.dtype)


def net_forward(x, params, *, batch_tile=256):
    """x: (B, 784) float32. params: pre-transposed (in, out) weights + (1, out) biases."""
    B, n_in = x.shape
    assert n_in == IN_FEATURES

    # Batch tile: >= 256 rows when the batch allows (MXU pass height on v6e/v7x),
    # otherwise the smallest sublane-aligned tile covering the batch.
    TB = batch_tile if B >= batch_tile else max(8, ((B + 7) // 8) * 8)
    Bp = ((B + TB - 1) // TB) * TB

    # Host-side layout prep: bf16 weights/activations, zero-pad K (784->896) and
    # the output N (16->128) so the kernel sees clean 128-multiples.
    bf16 = jnp.bfloat16
    x_p = jnp.zeros((Bp, IN_PAD), bf16).at[:B, :n_in].set(x.astype(bf16))
    w1 = jnp.zeros((IN_PAD, H1), bf16).at[:n_in].set(params["w1"].astype(bf16))
    w2 = params["w2"].astype(bf16)
    w3 = params["w3"].astype(bf16)
    w4 = jnp.zeros((H3, OUT_PAD), bf16).at[:, :N_CLASSES].set(params["w4"].astype(bf16))
    b1 = params["b1"].astype(jnp.float32)
    b2 = params["b2"].astype(jnp.float32)
    b3 = params["b3"].astype(jnp.float32)
    b4 = jnp.zeros((1, OUT_PAD), jnp.float32).at[:, :N_CLASSES].set(
        params["b4"].astype(jnp.float32))

    weights = (w1, b1, w2, b2, w3, b3, w4, b4)

    # Weights/biases: full-array blocks with a constant index_map -> stay resident
    # in VMEM across all batch tiles (single DMA).
    def resident(a):
        nd = a.ndim
        return pl.BlockSpec(a.shape, lambda i, _nd=nd: (0,) * _nd)

    flops = 2 * Bp * (IN_PAD * H1 + H1 * H2 + H2 * H3 + H3 * OUT_PAD)
    bytes_accessed = (x_p.size * x_p.dtype.itemsize
                      + sum(int(w.size) * w.dtype.itemsize for w in weights)
                      + Bp * OUT_PAD * 4)
    cost = pl.CostEstimate(flops=flops,
                           transcendentals=Bp * OUT_PAD,
                           bytes_accessed=bytes_accessed)

    out_padded = pl.pallas_call(
        functools.partial(mlp_kernel, n_classes=N_CLASSES),
        out_shape=jax.ShapeDtypeStruct((Bp, OUT_PAD), jnp.float32),
        grid=(Bp // TB,),
        in_specs=[pl.BlockSpec((TB, IN_PAD), lambda i: (i, 0))]
                 + [resident(a) for a in weights],
        out_specs=pl.BlockSpec((TB, OUT_PAD), lambda i: (i, 0)),
        compiler_params=pltpu.CompilerParams(
            dimension_semantics=("parallel",)),   # megacore batch sharding on v7x
        cost_estimate=cost,
    )(x_p, *weights)

    return out_padded[:B, :N_CLASSES]


def init_params(key):
    """Deterministic PyTorch-style init: U(-1/sqrt(fan_in), 1/sqrt(fan_in))."""
    dims = [(IN_FEATURES, H1), (H1, H2), (H2, H3), (H3, N_CLASSES)]
    params = {}
    for i, (fan_in, fan_out) in enumerate(dims, start=1):
        key, kw, kb = jax.random.split(key, 3)
        bound = 1.0 / jnp.sqrt(jnp.float32(fan_in))
        # stored as (in, out) == W.T relative to torch's (out, in)
        params[f"w{i}"] = jax.random.uniform(
            kw, (fan_in, fan_out), jnp.float32, -bound, bound)
        params[f"b{i}"] = jax.random.uniform(
            kb, (1, fan_out), jnp.float32, -bound, bound)
    return params


def net_forward_ref(x, p):
    """Pure-JAX reference with matching bf16-in / f32-accumulate arithmetic."""
    def lin(h, w, b):
        return jnp.dot(h.astype(jnp.bfloat16), w.astype(jnp.bfloat16),
                       preferred_element_type=jnp.float32) + b
    h = jnp.maximum(lin(x, p["w1"], p["b1"]), 0.0)
    h = jnp.maximum(lin(h, p["w2"], p["b2"]), 0.0)
    h = jnp.maximum(lin(h, p["w3"], p["b3"]), 0.0)
    logits = lin(h, p["w4"], p["b4"])
    return jax.nn.log_softmax(logits, axis=1)


if __name__ == "__main__":
    key = jax.random.PRNGKey(0)
    kx, kp = jax.random.split(key)

    batch = 8
    x = jax.random.normal(kx, (batch, IN_FEATURES), jnp.float32)
    params = init_params(kp)

    out = net_forward(x, params)
    out = jax.block_until_ready(out)

    ref = net_forward_ref(x, params)
    assert out.shape == (batch, N_CLASSES)
    assert jnp.allclose(out, ref, atol=2e-2, rtol=2e-2), "mismatch vs JAX reference"

    print("KERNEL_OK")
</pallas_src>

<mosaic_0001>
module attributes {stable_mosaic.version = 11 : i64} {
  func.func @mlp_kernel(%arg0: i32, %arg1: memref<8x896xbf16, #tpu.memory_space<vmem>>, %arg2: memref<896x128xbf16, #tpu.memory_space<vmem>>, %arg3: memref<1x128xf32, #tpu.memory_space<vmem>>, %arg4: memref<128x64xbf16, #tpu.memory_space<vmem>>, %arg5: memref<1x64xf32, #tpu.memory_space<vmem>>, %arg6: memref<64x32xbf16, #tpu.memory_space<vmem>>, %arg7: memref<1x32xf32, #tpu.memory_space<vmem>>, %arg8: memref<32x128xbf16, #tpu.memory_space<vmem>>, %arg9: memref<1x128xf32, #tpu.memory_space<vmem>>, %arg10: memref<8x128xf32, #tpu.memory_space<vmem>>) attributes {dimension_semantics = [#tpu.dimension_semantics<parallel>], iteration_bounds = array<i64: 1>, scalar_prefetch = 0 : i64, scratch_operands = 0 : i64, tpu.core_type = #tpu.core_type<tc>, window_params = [{transform_indices = @transform_0, window_bounds = array<i64: 8, 896>}, {pipeline_mode = #tpu.pipeline_mode<synchronous>, transform_indices = @transform_1, window_bounds = array<i64: 896, 128>}, {pipeline_mode = #tpu.pipeline_mode<synchronous>, transform_indices = @transform_2, window_bounds = array<i64: 1, 128>}, {pipeline_mode = #tpu.pipeline_mode<synchronous>, transform_indices = @transform_3, window_bounds = array<i64: 128, 64>}, {pipeline_mode = #tpu.pipeline_mode<synchronous>, transform_indices = @transform_4, window_bounds = array<i64: 1, 64>}, {pipeline_mode = #tpu.pipeline_mode<synchronous>, transform_indices = @transform_5, window_bounds = array<i64: 64, 32>}, {pipeline_mode = #tpu.pipeline_mode<synchronous>, transform_indices = @transform_6, window_bounds = array<i64: 1, 32>}, {pipeline_mode = #tpu.pipeline_mode<synchronous>, transform_indices = @transform_7, window_bounds = array<i64: 32, 128>}, {pipeline_mode = #tpu.pipeline_mode<synchronous>, transform_indices = @transform_8, window_bounds = array<i64: 1, 128>}, {transform_indices = @transform_9, window_bounds = array<i64: 8, 128>}]} {
    %c0 = arith.constant 0 : index
    %c0_0 = arith.constant 0 : index
    %0 = vector.load %arg1[%c0, %c0_0] : memref<8x896xbf16, #tpu.memory_space<vmem>>, vector<8x896xbf16>
    %c0_1 = arith.constant 0 : index
    %c0_2 = arith.constant 0 : index
    %1 = vector.load %arg2[%c0_1, %c0_2] : memref<896x128xbf16, #tpu.memory_space<vmem>>, vector<896x128xbf16>
    %cst = arith.constant dense<0.000000e+00> : vector<8x128xf32>
    %2 = tpu.matmul %0, %1, %cst {dimension_numbers = #tpu.dot_dimension_numbers<[1], [0], [0], [1], [0, 0, 1, 1], [], []>} : vector<8x896xbf16>, vector<896x128xbf16>, vector<8x128xf32> -> vector<8x128xf32>
    %c0_3 = arith.constant 0 : index
    %c0_4 = arith.constant 0 : index
    %3 = vector.load %arg3[%c0_3, %c0_4] : memref<1x128xf32, #tpu.memory_space<vmem>>, vector<1x128xf32>
    %4 = vector.broadcast %3 : vector<1x128xf32> to vector<8x128xf32>
    %5 = arith.addf %2, %4 : vector<8x128xf32>
    %cst_5 = arith.constant 0.000000e+00 : f32
    %6 = vector.broadcast %cst_5 : f32 to vector<8x128xf32>
    %7 = arith.maximumf %5, %6 : vector<8x128xf32>
    %8 = arith.truncf %7 : vector<8x128xf32> to vector<8x128xbf16>
    %c0_6 = arith.constant 0 : index
    %c0_7 = arith.constant 0 : index
    %9 = vector.load %arg4[%c0_6, %c0_7] : memref<128x64xbf16, #tpu.memory_space<vmem>>, vector<128x64xbf16>
    %cst_8 = arith.constant dense<0.000000e+00> : vector<8x64xf32>
    %10 = tpu.matmul %8, %9, %cst_8 {dimension_numbers = #tpu.dot_dimension_numbers<[1], [0], [0], [1], [0, 0, 1, 1], [], []>} : vector<8x128xbf16>, vector<128x64xbf16>, vector<8x64xf32> -> vector<8x64xf32>
    %c0_9 = arith.constant 0 : index
    %c0_10 = arith.constant 0 : index
    %11 = vector.load %arg5[%c0_9, %c0_10] : memref<1x64xf32, #tpu.memory_space<vmem>>, vector<1x64xf32>
    %12 = vector.broadcast %11 : vector<1x64xf32> to vector<8x64xf32>
    %13 = arith.addf %10, %12 : vector<8x64xf32>
    %cst_11 = arith.constant 0.000000e+00 : f32
    %14 = vector.broadcast %cst_11 : f32 to vector<8x64xf32>
    %15 = arith.maximumf %13, %14 : vector<8x64xf32>
    %16 = arith.truncf %15 : vector<8x64xf32> to vector<8x64xbf16>
    %c0_12 = arith.constant 0 : index
    %c0_13 = arith.constant 0 : index
    %17 = vector.load %arg6[%c0_12, %c0_13] : memref<64x32xbf16, #tpu.memory_space<vmem>>, vector<64x32xbf16>
    %cst_14 = arith.constant dense<0.000000e+00> : vector<8x32xf32>
    %18 = tpu.matmul %16, %17, %cst_14 {dimension_numbers = #tpu.dot_dimension_numbers<[1], [0], [0], [1], [0, 0, 1, 1], [], []>} : vector<8x64xbf16>, vector<64x32xbf16>, vector<8x32xf32> -> vector<8x32xf32>
    %c0_15 = arith.constant 0 : index
    %c0_16 = arith.constant 0 : index
    %19 = vector.load %arg7[%c0_15, %c0_16] : memref<1x32xf32, #tpu.memory_space<vmem>>, vector<1x32xf32>
    %20 = vector.broadcast %19 : vector<1x32xf32> to vector<8x32xf32>
    %21 = arith.addf %18, %20 : vector<8x32xf32>
    %cst_17 = arith.constant 0.000000e+00 : f32
    %22 = vector.broadcast %cst_17 : f32 to vector<8x32xf32>
    %23 = arith.maximumf %21, %22 : vector<8x32xf32>
    %24 = arith.truncf %23 : vector<8x32xf32> to vector<8x32xbf16>
    %c0_18 = arith.constant 0 : index
    %c0_19 = arith.constant 0 : index
    %25 = vector.load %arg8[%c0_18, %c0_19] : memref<32x128xbf16, #tpu.memory_space<vmem>>, vector<32x128xbf16>
    %cst_20 = arith.constant dense<0.000000e+00> : vector<8x128xf32>
    %26 = tpu.matmul %24, %25, %cst_20 {dimension_numbers = #tpu.dot_dimension_numbers<[1], [0], [0], [1], [0, 0, 1, 1], [], []>} : vector<8x32xbf16>, vector<32x128xbf16>, vector<8x128xf32> -> vector<8x128xf32>
    %c0_21 = arith.constant 0 : index
    %c0_22 = arith.constant 0 : index
    %27 = vector.load %arg9[%c0_21, %c0_22] : memref<1x128xf32, #tpu.memory_space<vmem>>, vector<1x128xf32>
    %28 = vector.broadcast %27 : vector<1x128xf32> to vector<8x128xf32>
    %29 = arith.addf %26, %28 : vector<8x128xf32>
    %30 = tpu.iota {dimensions = array<i32: 1>} : vector<8x128xi32>
    %c16_i32 = arith.constant 16 : i32
    %31 = vector.broadcast %c16_i32 : i32 to vector<8x128xi32>
    %32 = arith.cmpi slt, %30, %31 : vector<8x128xi32>
    %cst_23 = arith.constant 0xFF800000 : f32
    %33 = vector.broadcast %cst_23 : f32 to vector<8x128xf32>
    %34 = arith.select %32, %29, %33 : vector<8x128xi1>, vector<8x128xf32>
    %cst_24 = arith.constant dense<0xFF800000> : vector<8xf32>
    %35 = vector.multi_reduction <maximumf>, %34, %cst_24 [1] : vector<8x128xf32> to vector<8xf32>
    %36 = vector.shape_cast %35 : vector<8xf32> to vector<8x1xf32>
    %37 = vector.broadcast %36 : vector<8x1xf32> to vector<8x128xf32>
    %38 = arith.subf %29, %37 : vector<8x128xf32>
    %39 = math.exp %38 : vector<8x128xf32>
    %cst_25 = arith.constant 0.000000e+00 : f32
    %40 = vector.broadcast %cst_25 : f32 to vector<8x128xf32>
    %41 = arith.select %32, %39, %40 : vector<8x128xi1>, vector<8x128xf32>
    %cst_26 = arith.constant dense<0.000000e+00> : vector<8xf32>
    %42 = vector.multi_reduction <add>, %41, %cst_26 [1] : vector<8x128xf32> to vector<8xf32>
    %43 = vector.shape_cast %42 : vector<8xf32> to vector<8x1xf32>
    %44 = math.log %43 : vector<8x1xf32>
    %45 = vector.broadcast %44 : vector<8x1xf32> to vector<8x128xf32>
    %46 = arith.subf %38, %45 : vector<8x128xf32>
    %c0_27 = arith.constant 0 : index
    %c0_28 = arith.constant 0 : index
    %47 = vector.load %arg10[%c0_27, %c0_28] : memref<8x128xf32, #tpu.memory_space<vmem>>, vector<8x128xf32>
    tpu.vector_store %arg10[%c0_27, %c0_28], %46 {strides = array<i32>} : memref<8x128xf32, #tpu.memory_space<vmem>>, vector<8x128xf32>,
    return
  }
  func.func @transform_0(%arg0: i32) -> (i32, i32) {
    %c0_i32 = arith.constant 0 : i32
    %c0_i32_0 = arith.constant 0 : i32
    return %arg0, %c0_i32 : i32, i32
  }
  func.func @transform_1(%arg0: i32) -> (i32, i32) {
    %c0_i32 = arith.constant 0 : i32
    %c0_i32_0 = arith.constant 0 : i32
    %c0_i32_1 = arith.constant 0 : i32
    return %c0_i32, %c0_i32_0 : i32, i32
  }
  func.func @transform_2(%arg0: i32) -> (i32, i32) {
    %c0_i32 = arith.constant 0 : i32
    %c0_i32_0 = arith.constant 0 : i32
    %c0_i32_1 = arith.constant 0 : i32
    return %c0_i32, %c0_i32_0 : i32, i32
  }
  func.func @transform_3(%arg0: i32) -> (i32, i32) {
    %c0_i32 = arith.constant 0 : i32
    %c0_i32_0 = arith.constant 0 : i32
    %c0_i32_1 = arith.constant 0 : i32
    return %c0_i32, %c0_i32_0 : i32, i32
  }
  func.func @transform_4(%arg0: i32) -> (i32, i32) {
    %c0_i32 = arith.constant 0 : i32
    %c0_i32_0 = arith.constant 0 : i32
    %c0_i32_1 = arith.constant 0 : i32
    return %c0_i32, %c0_i32_0 : i32, i32
  }
  func.func @transform_5(%arg0: i32) -> (i32, i32) {
    %c0_i32 = arith.constant 0 : i32
    %c0_i32_0 = arith.constant 0 : i32
    %c0_i32_1 = arith.constant 0 : i32
    return %c0_i32, %c0_i32_0 : i32, i32
  }
  func.func @transform_6(%arg0: i32) -> (i32, i32) {
    %c0_i32 = arith.constant 0 : i32
    %c0_i32_0 = arith.constant 0 : i32
    %c0_i32_1 = arith.constant 0 : i32
    return %c0_i32, %c0_i32_0 : i32, i32
  }
  func.func @transform_7(%arg0: i32) -> (i32, i32) {
    %c0_i32 = arith.constant 0 : i32
    %c0_i32_0 = arith.constant 0 : i32
    %c0_i32_1 = arith.constant 0 : i32
    return %c0_i32, %c0_i32_0 : i32, i32
  }
  func.func @transform_8(%arg0: i32) -> (i32, i32) {
    %c0_i32 = arith.constant 0 : i32
    %c0_i32_0 = arith.constant 0 : i32
    %c0_i32_1 = arith.constant 0 : i32
    return %c0_i32, %c0_i32_0 : i32, i32
  }
  func.func @transform_9(%arg0: i32) -> (i32, i32) {
    %c0_i32 = arith.constant 0 : i32
    %c0_i32_0 = arith.constant 0 : i32
    return %arg0, %c0_i32 : i32, i32
  }
}

</mosaic_0001>

<bundles_post_ra>
// kernel: tpu_custom_call.1
= control target key start
LH: loop header
LB: loop body
LE: loop exit
PB: predicated region body
PF: predicated region fallthrough
CT: control target
= control target key end

     0   :  { %14 = vsyncpa [#allocation3], 0  ;;  %s1374_s0 = inlined_call_operand.vmem [shape: bf16[8,896], index: 0, kind: input, shape index: {}]   ;;  %s1375_s1 = inlined_call_operand.hbm [shape: bf16[896,128], index: 1, kind: input, shape index: {}]   ;;  %s1376_s2 = inlined_call_operand.vmem [shape: f32[1,128], index: 2, kind: input, shape index: {}]   ;;  %s1377_s3 = inlined_call_operand.vmem [shape: bf16[128,64], index: 3, kind: input, shape index: {}]   ;;  %s1378_s4 = inlined_call_operand.vmem [shape: f32[1,64], index: 4, kind: input, shape index: {}]   ;;  %s1379_s5 = inlined_call_operand.vmem [shape: bf16[64,32], index: 5, kind: input, shape index: {}]   ;;  %s1380_s6 = inlined_call_operand.vmem [shape: f32[1,32], index: 6, kind: input, shape index: {}]   ;;  %s1381_s7 = inlined_call_operand.vmem [shape: bf16[32,128], index: 7, kind: input, shape index: {}]   ;;  %s1382_s8 = inlined_call_operand.vmem [shape: f32[1,128], index: 8, kind: input, shape index: {}]   ;;  %s1383_s9 = inlined_call_operand.hbm [shape: f32[8,128], index: 9, kind: output, shape index: {}]  }
   0x1   :  { %15 = vsyncpa [#allocation4], 0  ;;  %s22_s11 = sshll.u32 %s1375_s1, 4  ;;  %s1248_s12 = smov [#allocation2]   ;;  %s23_s11 = int_to_ptr.hbm [resolvable:$true] %s22_s11 }
   0x2   :  { %s24_s13 = sshll.u32 %s1248_s12, 4  ;;  %s1249_s14 = smov 64   ;;  %s25_s13 = int_to_ptr.vmem [resolvable:$true] %s24_s13 }
   0x3   :  { %s1250_s15 = smov 4  }
   0x4   :  { %30 = dma.hbm_to_vmem [thread:$0]  %s23_s11, 7168, %s25_s13, [#allocation3], %s1249_s14, %s1249_s14, %s1250_s15  }
   0x5   :  { %1244 = dma.done.wait [#allocation3], 7168  }
   0x6   :  { %1245 = vsyncadd [#allocation3], 4294960128  ;;  %v1121_v0 = vld [vmem:[#allocation2 + $0x38] sm:$0xff]  ;;  %v1120_v3 = vld [vmem:[#allocation2 + $0x30] sm:$0xff]  ;;  %vm743_vm0 = vcmask 523264   ;;  %vm782_vm1 = vcmask 261120  }
   0x7   :  { %v1129_v1 = vld [vmem:[#allocation2 + $0x78] sm:$0xff]  ;;  %531 = vmatpush.bf16.msra.mxu0 %v1121_v0  ;;  %v1128_v4 = vld [vmem:[#allocation2 + $0x70] sm:$0xff]  ;;  %v1119_v7 = vld [vmem:[#allocation2 + $0x28] sm:$0xff]  ;;  %s822_s11 = sshll.u32 %s1383_s9, 4  ;;  %s823_s11 = int_to_ptr.hbm [resolvable:$true] %s822_s11 }
   0x8   :  { %v1137_v2 = vld [vmem:[#allocation2 + $0xb8] sm:$0xff]  ;;  %544 = vmatpush.bf16.msra.mxu1 %v1129_v1  ;;  %v1136_v5 = vld [vmem:[#allocation2 + $0xb0] sm:$0xff]  ;;  %v1127_v8 = vld [vmem:[#allocation2 + $0x68] sm:$0xff] }
   0x9   :  { %557 = vmatpush.bf16.msra.mxu2 %v1137_v2  ;;  %v1145_v6 = vld [vmem:[#allocation2 + $0xf8] sm:$0xff]  ;;  %v1135_v9 = vld [vmem:[#allocation2 + $0xa8] sm:$0xff]  ;;  %v1144_v10 = vld [vmem:[#allocation2 + $0xf0] sm:$0xff] }
   0xa   :  { %570 = vmatpush.bf16.msra.mxu3 %v1145_v6  ;;  %v1118_v11 = vld [vmem:[#allocation2 + $0x20] sm:$0xff]  ;;  %v1143_v14 = vld [vmem:[#allocation2 + $0xe8] sm:$0xff]  ;;  %v1117_v15 = vld [vmem:[#allocation2 + $0x18] sm:$0xff] }
   0xb   :  { %532 = vmatpush.bf16.msra.mxu0 %v1120_v3  ;;  %v1126_v12 = vld [vmem:[#allocation2 + $0x60] sm:$0xff]  ;;  %v1125_v16 = vld [vmem:[#allocation2 + $0x58] sm:$0xff]  ;;  %v1116_v19 = vld [vmem:[#allocation2 + $0x10] sm:$0xff] }
   0xc   :  { %545 = vmatpush.bf16.msra.mxu1 %v1128_v4  ;;  %v1134_v13 = vld [vmem:[#allocation2 + $0xa0] sm:$0xff]  ;;  %v1133_v17 = vld [vmem:[#allocation2 + $0x98] sm:$0xff]  ;;  %v1124_v20 = vld [vmem:[#allocation2 + $0x50] sm:$0xff] }
   0xd   :  { %558 = vmatpush.bf16.msra.mxu2 %v1136_v5  ;;  %v1142_v18 = vld [vmem:[#allocation2 + $0xe0] sm:$0xff]  ;;  %v1132_v21 = vld [vmem:[#allocation2 + $0x90] sm:$0xff]  ;;  %v1141_v22 = vld [vmem:[#allocation2 + $0xd8] sm:$0xff] }
   0xe   :  { %571 = vmatpush.bf16.msra.mxu3 %v1144_v10  ;;  %v1115_v23 = vld [vmem:[#allocation2 + $0x8] sm:$0xff]  ;;  %v50_v25 = vld [vmem:[%s1374_s0] sm:$0xff]  ;;  %v1140_v27 = vld [vmem:[#allocation2 + $0xd0] sm:$0xff] }
   0xf   :  { %533 = vmatpush.bf16.msra.mxu0 %v1119_v7  ;;  %v1123_v24 = vld [vmem:[#allocation2 + $0x48] sm:$0xff]  ;;  %v174_v29 = vunpack.c.l.b16 %v50_v25  ;;  %v1114_v30 = vld [vmem:[#allocation2] sm:$0xff]  ;;  %v175_v33 = vunpack.c.h.b16 %v50_v25  ;;  %v1153_v35 = vld [vmem:[#allocation2 + $0x138] sm:$0xff] }
  0x10   :  { %546 = vmatpush.bf16.msra.mxu1 %v1127_v8  ;;  %v1131_v26 = vld [vmem:[#allocation2 + $0x88] sm:$0xff]  ;;  %v1122_v31 = vld [vmem:[#allocation2 + $0x40] sm:$0xff]  ;;  %v1161_v36 = vld [vmem:[#allocation2 + $0x178] sm:$0xff] }
  0x11   :  { %559 = vmatpush.bf16.msra.mxu2 %v1135_v9  ;;  %v51_v28 = vld [vmem:[%s1374_s0 + $0x8] sm:$0xff]  ;;  %v1130_v34 = vld [vmem:[#allocation2 + $0x80] sm:$0xff]  ;;  %v1169_v37 = vld [vmem:[#allocation2 + $0x1b8] sm:$0xff]  ;;  %v181_v38 = vpack.c.b16 %v174_v29, %v174_v29  ;;  %v182_v41 = vpack.c.b16 %v175_v33, %v175_v33 }
  0x12   :  { %572 = vmatpush.bf16.msra.mxu3 %v1143_v14  ;;  %v176_v32 = vunpack.c.l.b16 %v51_v28  ;;  %v1139_v39 = vld [vmem:[#allocation2 + $0xc8] sm:$0xff]  ;;  %v1152_v42 = vld [vmem:[#allocation2 + $0x130] sm:$0xff]  ;;  %v1138_v45 = vld [vmem:[#allocation2 + $0xc0] sm:$0xff]  ;;  %v177_v46 = vunpack.c.h.b16 %v51_v28 }
  0x13   :  { %534 = vmatpush.bf16.msra.mxu0 %v1118_v11  ;;  %v1160_v43 = vld [vmem:[#allocation2 + $0x170] sm:$0xff]  ;;  %v1151_v47 = vld [vmem:[#allocation2 + $0x128] sm:$0xff]  ;;  %v1150_v51 = vld [vmem:[#allocation2 + $0x120] sm:$0xff] }
  0x14   :  { %547 = vmatpush.bf16.msra.mxu1 %v1126_v12  ;;  %v183_v40 = vpack.c.b16 %v176_v32, %v176_v32  ;;  %v1168_v44 = vld [vmem:[#allocation2 + $0x1b0] sm:$0xff]  ;;  %v1159_v48 = vld [vmem:[#allocation2 + $0x168] sm:$0xff]  ;;  %v184_v50 = vpack.c.b16 %v177_v46, %v177_v46  ;;  %v1158_v52 = vld [vmem:[#allocation2 + $0x160] sm:$0xff] }
  0x15   :  { %560 = vmatpush.bf16.msra.mxu2 %v1134_v13  ;;  %v1167_v49 = vld [vmem:[#allocation2 + $0x1a8] sm:$0xff]  ;;  %v1166_v53 = vld [vmem:[#allocation2 + $0x1a0] sm:$0xff]  ;;  %v1149_v54 = vld [vmem:[#allocation2 + $0x118] sm:$0xff] }
  0x16   :  { %573 = vmatpush.bf16.msra.mxu3 %v1142_v18  ;;  %v1157_v55 = vld [vmem:[#allocation2 + $0x158] sm:$0xff]  ;;  %v1148_v57 = vld [vmem:[#allocation2 + $0x110] sm:$0xff]  ;;  %v1147_v60 = vld [vmem:[#allocation2 + $0x108] sm:$0xff] }
  0x17   :  { %535 = vmatpush.bf16.msra.mxu0 %v1117_v15  ;;  %v1165_v56 = vld [vmem:[#allocation2 + $0x198] sm:$0xff]  ;;  %v1156_v58 = vld [vmem:[#allocation2 + $0x150] sm:$0xff]  ;;  %v1155_v62 = vld [vmem:[#allocation2 + $0x148] sm:$0xff] }
  0x18   :  { %548 = vmatpush.bf16.msra.mxu1 %v1125_v16  ;;  %v1164_v59 = vld [vmem:[#allocation2 + $0x190] sm:$0xff]  ;;  %v1163_v63 = vld [vmem:[#allocation2 + $0x188] sm:$0xff]  ;;  %v53_v0 = vld [vmem:[%s1374_s0 + $0x18] sm:$0xf] }
  0x19   :  { %561 = vmatpush.bf16.msra.mxu2 %v1133_v17  ;;  %v52_v61 = vld [vmem:[%s1374_s0 + $0x10] sm:$0xff]  ;;  %v1146_v2 = vld [vmem:[#allocation2 + $0x100] sm:$0xff]  ;;  %v180_v4 = vunpack.c.l.b16 %v53_v0  ;;  %v1177_v10 = vld [vmem:[%s1377_s3 + $0x38] sm:$0xff] }
  0x1a   :  { %574 = vmatpush.bf16.msra.mxu3 %v1141_v22  ;;  %v178_v1 = vunpack.c.l.b16 %v52_v61  ;;  %v179_v3 = vunpack.c.h.b16 %v52_v61  ;;  %v1154_v5 = vld [vmem:[#allocation2 + $0x140] sm:$0xff]  ;;  %v1176_v11 = vld [vmem:[%s1377_s3 + $0x30] sm:$0xff]  ;;  %v1175_v12 = vld [vmem:[%s1377_s3 + $0x28] sm:$0xff] }
  0x1b   :  { %536 = vmatpush.bf16.msra.mxu0 %v1116_v19  ;;  %v1162_v6 = vld [vmem:[#allocation2 + $0x180] sm:$0xff]  ;;  %v187_v9 = vpack.c.b16 %v180_v4, %v180_v4  ;;  %v1173_v14 = vld [vmem:[%s1377_s3 + $0x18] sm:$0xff]  ;;  %v1172_v15 = vld [vmem:[%s1377_s3 + $0x10] sm:$0xff] }
  0x1c   :  { %549 = vmatpush.bf16.msra.mxu1 %v1124_v20  ;;  %v185_v7 = vpack.c.b16 %v178_v1, %v178_v1  ;;  %v186_v8 = vpack.c.b16 %v179_v3, %v179_v3  ;;  %v1174_v13 = vld [vmem:[%s1377_s3 + $0x20] sm:$0xff]  ;;  %v1171_v18 = vld [vmem:[%s1377_s3 + $0x8] sm:$0xff] }
  0x1d   :  { %562 = vmatpush.bf16.msra.mxu2 %v1132_v21  ;;  %v1170_v19 = vld [vmem:[%s1377_s3] sm:$0xff]  ;;  %v1179_v29 = vld [vmem:[%s1379_s5 + $0x8] sm:$0xff] }
  0x1e   :  { %575 = vmatpush.bf16.msra.mxu3 %v1140_v27  ;;  %v1183_v46 = vld [vmem:[%s1381_s7 + $0x8] sm:$0xff] }
  0x1f   :  { %537 = vmatpush.bf16.msra.mxu0 %v1115_v23  ;;  %v1181_v23 = vld [vmem:[%s1379_s5 + $0x18] sm:$0xff] }
  0x20   :  { %550 = vmatpush.bf16.msra.mxu1 %v1123_v24  ;;  %v1188_v24 = vld [vmem:[%s1376_s2] ss:$0 sm:$0xff] }
  0x21   :  { %563 = vmatpush.bf16.msra.mxu2 %v1131_v26  ;;  %v1180_v26 = vld [vmem:[%s1379_s5 + $0x10] sm:$0xff] }
  0x22   :  { %576 = vmatpush.bf16.msra.mxu3 %v1139_v39 }
  0x23   :  { %538 = vmatpush.bf16.msra.mxu0 %v1114_v30 }
  0x24   :  { %551 = vmatpush.bf16.msra.mxu1 %v1122_v31 }
  0x25   :  { %564 = vmatpush.bf16.msra.mxu2 %v1130_v34 }
  0x26   :  { %539 = vmatmul.bf16.vlgmr.msra.gmra.mxu0 %v181_v38  ;;  %577 = vmatpush.bf16.msra.mxu3 %v1138_v45  ;;  %v1178_v45 = vld [vmem:[%s1379_s5] sm:$0xff] }
  0x27   :  { %583 = vmatpush.bf16.msrb.mxu0 %v1153_v35  ;;  %552 = vmatmul.bf16.vlgmr.msra.gmra.mxu1 %v182_v41 }
  0x28   :  { %596 = vmatpush.bf16.msrb.mxu1 %v1161_v36  ;;  %565 = vmatmul.bf16.vlgmr.msra.gmra.mxu2 %v183_v40 }
  0x29   :  { %609 = vmatpush.bf16.msrb.mxu2 %v1169_v37  ;;  %578 = vmatmul.bf16.vlgmr.msra.gmra.mxu3 %v184_v50 }
  0x2a   :  { %692 = vmatpush.bf16.msrb.mxu3 %v1177_v10 }
  0x2b   :  { %584 = vmatpush.bf16.msrb.mxu0 %v1152_v42 }
  0x2c   :  { %597 = vmatpush.bf16.msrb.mxu1 %v1160_v43 }
  0x2d   :  { %610 = vmatpush.bf16.msrb.mxu2 %v1168_v44 }
  0x2e   :  { %693 = vmatpush.bf16.msrb.mxu3 %v1176_v11 }
  0x2f   :  { %585 = vmatpush.bf16.msrb.mxu0 %v1151_v47  ;;  %v1182_v47 = vld [vmem:[%s1381_s7] sm:$0xff] }
  0x30   :  { %598 = vmatpush.bf16.msrb.mxu1 %v1159_v48  ;;  %v1189_v48 = vld [vmem:[%s1378_s4] ss:$0 sm:$0xff] }
  0x31   :  { %611 = vmatpush.bf16.msrb.mxu2 %v1167_v49 }
  0x32   :  { %694 = vmatpush.bf16.msrb.mxu3 %v1175_v12 }
  0x33   :  { %586 = vmatpush.bf16.msrb.mxu0 %v1150_v51 }
  0x34   :  { %599 = vmatpush.bf16.msrb.mxu1 %v1158_v52 }
  0x35   :  { %612 = vmatpush.bf16.msrb.mxu2 %v1166_v53 }
  0x36   :  { %695 = vmatpush.bf16.msrb.mxu3 %v1174_v13 }
  0x37   :  { %587 = vmatpush.bf16.msrb.mxu0 %v1149_v54  ;;  %v1190_v54 = vld [vmem:[%s1380_s6] ss:$0 sm:$0xff]  ;;  %s1251_s6 = smov [#allocation5]  }
  0x38   :  { %600 = vmatpush.bf16.msrb.mxu1 %v1157_v55  ;;  %s820_s30 = sshll.u32 %s1251_s6, 4  ;;  %s821_s30 = int_to_ptr.vmem [resolvable:$true] %s820_s30 }
  0x39   :  { %613 = vmatpush.bf16.msrb.mxu2 %v1165_v56 }
  0x3a   :  { %696 = vmatpush.bf16.msrb.mxu3 %v1173_v14 }
  0x3b   :  { %588 = vmatpush.bf16.msrb.mxu0 %v1148_v57 }
  0x3c   :  { %601 = vmatpush.bf16.msrb.mxu1 %v1156_v58 }
  0x3d   :  { %614 = vmatpush.bf16.msrb.mxu2 %v1164_v59 }
  0x3e   :  { %697 = vmatpush.bf16.msrb.mxu3 %v1172_v15 }
  0x3f   :  { %589 = vmatpush.bf16.msrb.mxu0 %v1147_v60  ;;  %v799_v60 = vlaneseq }
  0x40   :  { %602 = vmatpush.bf16.msrb.mxu1 %v1155_v62  ;;  %v1191_v62 = vld [vmem:[%s1382_s8] ss:$0 sm:$0xff] }
  0x41   :  { %615 = vmatpush.bf16.msrb.mxu2 %v1163_v63  ;;  %v800_v61 = vand.u32 127, %v799_v60 }
  0x42   :  { %698 = vmatpush.bf16.msrb.mxu3 %v1171_v18 }
  0x43   :  { %590 = vmatpush.bf16.msrb.mxu0 %v1146_v2  ;;  %vm801_vm2 = vcmp.lt.s32.totalorder %v800_v61, 16 }
  0x44   :  { %603 = vmatpush.bf16.msrb.mxu1 %v1154_v5 }
  0x45   :  { %616 = vmatpush.bf16.msrb.mxu2 %v1162_v6 }
  0x46   :  { %591 = vmatmul.bf16.vlgmr.msrb.gmra.mxu0 %v185_v7  ;;  %699 = vmatpush.bf16.msrb.mxu3 %v1170_v19 }
  0x47   :  { %604 = vmatmul.bf16.vlgmr.msrb.gmra.mxu1 %v186_v8  ;;  %751 = vmatpush.bf16.msra.mxu0 %v1181_v23 }
  0x48   :  { %617 = vmatmul.bf16.vlgmr.msrb.gmra.mxu2 %v187_v9  ;;  %792 = vmatpush.bf16.msra.mxu1 %v1183_v46 }
  0x4b   :  { %752 = vmatpush.bf16.msra.mxu0 %v1180_v26 }
  0x4c   :  { %793 = vmatpush.bf16.msra.mxu1 %v1182_v47 }
  0x4f   :  { %753 = vmatpush.bf16.msra.mxu0 %v1179_v29 }
  0x53   :  { %754 = vmatpush.bf16.msra.mxu0 %v1178_v45 }
  0xa3   :  { %v540_v16 = vpop.f32.mrf.mxu0 }
  0xa4   :  { %v553_v17 = vpop.f32.mrf.mxu1  ;;  %v541_v28 = vadd.f32 %v1188_v24, %v540_v16 }
  0xa6   :  { %v554_v30 = vadd.f32 %v553_v17, %v541_v28 }
  0xab   :  { %v566_v20 = vpop.f32.mrf.mxu2  ;;  %v542_v21 = vpop.f32.mrf.mxu0 }
  0xac   :  { %v555_v22 = vpop.f32.mrf.mxu1  ;;  %v579_v25 = vpop.f32.mrf.mxu3  ;;  %v567_v32 = vadd.f32 %v566_v20, %v554_v30 }
  0xae   :  { %v580_v33 = vadd.f32 %v579_v25, %v567_v32 }
  0xb3   :  { %v568_v27 = vpop.f32.mrf.mxu2 }
  0xb4   :  { %v581_v31 = vpop.f32.mrf.mxu3 }
  0xc3   :  { %v592_v34 = vpop.f32.mrf.mxu0 }
  0xc4   :  { %v605_v35 = vpop.f32.mrf.mxu1  ;;  %v593_v36 = vadd.f32 %v592_v34, %v580_v33 }
  0xc6   :  { %v606_v37 = vadd.f32 %v605_v35, %v593_v36 }
  0xcb   :  { %v618_v38 = vpop.f32.mrf.mxu2  ;;  %v594_v40 = vpop.f32.mrf.mxu0 }
  0xcc   :  { %v619_v39 = vadd.f32 %v618_v38, %v606_v37  ;;  %v607_v41 = vpop.f32.mrf.mxu1 }
  0xce   :  { %v622_v42 = vmax.f32 %v619_v39, 0.0 }
  0xd0   :  { %v623_v43 = vpack.c.bf16 %v622_v42, %v622_v42 }
  0xd2   :  { %700 = vmatmul.bf16.vlgmr.msrb.gmra.mxu3 %v623_v43 }
  0xd3   :  { %v620_v44 = vpop.f32.mrf.mxu2 }
 0x155   :  { %v701_v49 = vpop.f32.mrf.mxu3 }
 0x156   :  { %v702_v50 = vadd.f32 %v1189_v48, %v701_v49 }
 0x158   :  { %v705_v51 = vmax.f32 %v702_v50, 0.0 }
 0x15a   :  { %v706_v52 = vpack.c.bf16 %v705_v51, %v705_v51 }
 0x15c   :  { %1104 = vmatmul.msk.bf16.vlgmr.msra.gmra.mxu0 %vm743_vm0, %v706_v52 }
 0x15d   :  { %v703_v53 = vpop.f32.mrf.mxu3 }
 0x1d9   :  { %v756_v55 = vpop.f32.mrf.mxu0 }
 0x1da   :  { %v757_v56 = vadd.f32 %v1190_v54, %v756_v55 }
 0x1dc   :  { %v760_v57 = vmax.f32 %v757_v56, 0.0 }
 0x1de   :  { %v761_v58 = vpack.c.bf16 %v760_v57, %v760_v57 }
 0x1e0   :  { %1113 = vmatmul.msk.bf16.vlgmr.msra.gmra.mxu1 %vm782_vm1, %v761_v58 }
 0x1e1   :  { %v758_v59 = vpop.f32.mrf.mxu0 }
 0x25d   :  { %v795_v63 = vpop.f32.mrf.mxu1 }
 0x25e   :  { %v796_v0 = vadd.f32 %v1191_v62, %v795_v63 }
 0x260   :  { %v802_v1 = vsel %vm801_vm2, %v796_v0, -inf }
 0x261   :  { %803 = vmax.xlane.f32.xlu0 %v802_v1 }
 0x265   :  { %v797_v2 = vpop.f32.mrf.mxu1 }
 0x2d4   :  { %v804_v3 = vpop.xlane.xlu0 %803 }
 0x2d5   :  { %v805_v4 = vsub.f32 %v796_v0, %v804_v3 }
 0x2d7   :  { %v806_v5 = vmul.f32 1.442695, %v805_v4 }
 0x2d9   :  { %1192 = vpow2.f32 %v806_v5 }
 0x2df   :  { %v1193_v6 = vpop.eup %1192 }
 0x2e0   :  { %v808_v7 = vsel %vm801_vm2, %v1193_v6, 0.0 }
 0x2e1   :  { %809 = vadd.xlane.f32.xlu0 %v808_v7 }
 0x354   :  { %v810_v8 = vpop.xlane.xlu0 %809 }
 0x355   :  { %1194 = vlog2.f32 %v810_v8 }
 0x35b   :  { %v1195_v9 = vpop.eup %1194 }
 0x35c   :  { %v812_v10 = vmul.f32 0.6931472, %v1195_v9 }
 0x35e   :  { %v813_v11 = vsub.f32 %v805_v4, %v812_v10 }
 0x360   :  { %814 = vst [vmem:[#allocation5] sm:$0xff] %v813_v11 }
 0x361   :  { %825 = dma.vmem_to_hbm [thread:$0]  %s821_s30, 128, %s823_s11, [#allocation4]  }
 0x362   :  { %1246 = dma.done.wait [#allocation4], 128  }
 0x363   :  { %1247 = vsyncadd [#allocation4], 4294967168 }
 0x364   :  { %830 = vsyncpa [#allocation3], 1 }
 0x365   :  { %831 = vsyncpa [#allocation4], 1 }

</bundles_post_ra>
